<compile_context>
chip_gen: v6e
topology: v6e:2x2x1
jax: 0.10.0
libtpu: 0.0.40
codegen_flags: <defaults>
</compile_context>

<pallas_src>
import functools

import numpy as np
import jax
import jax.numpy as jnp
from jax.experimental import pallas as pl
from jax.experimental.pallas import tpu as pltpu


def _attention_kernel(x_ref, wp_ref, a2_ref, b_ref, o_ref, *,
                      heads, dim_head, compute_dtype):
    bt, n, d = x_ref.shape
    inner = heads * dim_head
    off_v = 2 * inner                 # start of per-head folded value columns
    off_t = 2 * inner + heads * d     # start of the fused t-stream columns
    r = bt * n

    # ---- one fused, lane-dense projection: [q*scale | k | per-head xv | xt] ----
    x2 = x_ref[...].reshape(r, d)                           # merge leading dims
    p32 = jnp.dot(x2.astype(compute_dtype), wp_ref[...],
                  preferred_element_type=jnp.float32)       # (R, 2*inner+(H+1)*D)

    # One shared transpose of the k slice -> every dots matmul below is a
    # plain (N, Dh) @ (Dh, N) contraction (no per-(b, h) transpose of k).
    k_t = p32[:, inner:2 * inner].T.astype(compute_dtype)   # (inner, R)
    p = p32.astype(compute_dtype)

    a2 = a2_ref[...]                  # (N, N), compute dtype (matmul lhs only)
    bias = b_ref[...]                 # (1, D) f32

    for b_i in range(bt):             # static unroll over the batch block
        rs = b_i * n

        # attn2 / positional stream: a2 @ (x_b @ (Wt @ Wo_t)), head-free.
        xt_b = p[rs:rs + n, off_t:off_t + d]                        # (N, D)
        acc = jnp.dot(a2, xt_b, preferred_element_type=jnp.float32)  # (N, D) f32

        # attn1 / softmax stream, accumulated per head into the same f32 acc.
        for hi in range(heads):
            q_bh = p[rs:rs + n, hi * dim_head:(hi + 1) * dim_head]    # (N, Dh)
            kt_bh = k_t[hi * dim_head:(hi + 1) * dim_head, rs:rs + n]  # (Dh, N)
            dots = jnp.dot(q_bh, kt_bh,
                           preferred_element_type=jnp.float32)        # (N, N) f32
            dmax = jnp.max(dots, axis=-1, keepdims=True)
            e = jnp.exp(dots - dmax)                                   # f32 (v5e-safe)
            den = jnp.sum(e, axis=-1, keepdims=True)
            attn = e * pl.reciprocal(den, approx=True)                 # EUP reciprocal
            xv_bh = p[rs:rs + n, off_v + hi * d: off_v + (hi + 1) * d]  # (N, D)
            acc = acc + jnp.dot(attn.astype(compute_dtype), xv_bh,
                                preferred_element_type=jnp.float32)

        o_ref[b_i] = (acc + bias).astype(o_ref.dtype)


def prepare_attention_params(w_qkv, w_out, b_out, *, heads, dim_head, n,
                             compute_dtype=jnp.bfloat16):
    """One-time host-side (numpy) weight fusion + positional kernel. Call once."""
    w_qkv = np.asarray(w_qkv, dtype=np.float32)
    w_out = np.asarray(w_out, dtype=np.float32)
    b_out = np.asarray(b_out, dtype=np.float32)
    d = w_qkv.shape[0]
    inner = heads * dim_head
    assert w_qkv.shape == (d, 4 * inner)
    assert w_out.shape == (2 * inner, d)
    scale = dim_head ** -0.5

    wq = w_qkv[:, 0 * inner:1 * inner] * scale      # softmax scale folded into q
    wk = w_qkv[:, 1 * inner:2 * inner]
    wv = w_qkv[:, 2 * inner:3 * inner]
    wt = w_qkv[:, 3 * inner:4 * inner]

    # w_out rows are ordered (head, stream[v|t], dh) after the module's
    # concat([attn1@v, attn2@t], -1) + rearrange('b h n d -> b n (h d)').
    wo = w_out.reshape(heads, 2, dim_head, d)
    wo_v = wo[:, 0]                                  # (H, Dh, D)  attn1 stream
    wo_t = wo[:, 1].reshape(inner, d)                # (inner, D)  attn2 stream

    # Fold value + output projections per head: xv_h = x @ (Wv_h @ Wo_v_h).
    m_v = np.concatenate(
        [wv[:, h * dim_head:(h + 1) * dim_head] @ wo_v[h] for h in range(heads)],
        axis=1)                                      # (D, H*D)
    # attn2 is head-independent -> whole t path collapses to one (D, D) matrix.
    wt_fused = wt @ wo_t                             # (D, D)

    wp = np.concatenate([wq, wk, m_v, wt_fused], axis=1)  # (D, 2*inner+(H+1)*D)

    # Positional attention matrix with the exact torch broadcasting quirk:
    # a2[i, j] = exp(-|i-j|/e) / sum_k exp(-|j-k|/e).
    idx = np.arange(n, dtype=np.float32)
    tg = np.abs(idx[None, :] - idx[:, None])
    a2 = np.exp(-tg / np.exp(1.0)).astype(np.float32)
    a2 = a2 / a2.sum(-1)

    return dict(
        wp=jnp.asarray(wp, dtype=compute_dtype),
        a2=jnp.asarray(a2, dtype=compute_dtype),
        b2=jnp.asarray(b_out.reshape(1, d), dtype=jnp.float32),
        heads=heads, dim_head=dim_head, compute_dtype=compute_dtype,
    )


def _pick_block_b(b, n, target_rows=256):
    """Largest divisor of b with block_b * n <= target_rows.  No '>=2 grid
    steps' rule: the grid is a sequential loop on a single TensorCore, so small
    problems should run in ONE step."""
    cap = max(1, target_rows // max(n, 1))
    best = 1
    for bt in range(1, b + 1):
        if b % bt == 0 and bt <= cap:
            best = bt
    return best


def attention_forward(x, params, *, block_b=None):
    b, n, d = x.shape
    heads, dim_head = params["heads"], params["dim_head"]
    wp, a2, b2 = params["wp"], params["a2"], params["b2"]
    assert a2.shape == (n, n), "params were prepared for a different sequence length"
    wp_w = wp.shape[1]

    if block_b is None:
        block_b = _pick_block_b(b, n)
    assert b % block_b == 0
    grid = (b // block_b,)

    kernel = functools.partial(
        _attention_kernel, heads=heads, dim_head=dim_head,
        compute_dtype=params["compute_dtype"])

    out = pl.pallas_call(
        kernel,
        out_shape=jax.ShapeDtypeStruct((b, n, d), x.dtype),
        grid_spec=pltpu.PrefetchScalarGridSpec(
            num_scalar_prefetch=0,
            grid=grid,
            in_specs=[
                pl.BlockSpec((block_b, n, d), lambda i: (i, 0, 0)),
                pl.BlockSpec((d, wp_w), lambda i: (0, 0)),
                pl.BlockSpec((n, n), lambda i: (0, 0)),
                pl.BlockSpec((1, d), lambda i: (0, 0)),
            ],
            out_specs=pl.BlockSpec((block_b, n, d), lambda i: (i, 0, 0)),
        ),
        compiler_params=pltpu.CompilerParams(
            # "parallel" vs "arbitrary" doesn't change codegen; for large B on
            # v7x use pltpu.CORE_PARALLEL on this axis to engage both cores.
            dimension_semantics=("arbitrary",),
            vmem_limit_bytes=32 * 1024 * 1024),
    )(x, wp, a2, b2)
    return out


def attention_reference(x, w_qkv, w_out, b_out, *, heads, dim_head):
    b, n, d = x.shape
    scale = dim_head ** -0.5
    qkvt = x @ w_qkv                                                   # (B, N, 4*inner)
    q, k, v, t = jnp.split(qkvt, 4, axis=-1)

    def split_heads(a):
        return a.reshape(b, n, heads, dim_head).transpose(0, 2, 1, 3)  # (B, H, N, Dh)

    q, k, v, t = map(split_heads, (q, k, v, t))
    dots = jnp.einsum('bhid,bhjd->bhij', q, k) * scale
    attn1 = jax.nn.softmax(dots, axis=-1)
    idx = jnp.arange(n, dtype=jnp.float32)
    tg = jnp.abs(idx[None, :] - idx[:, None])
    a2 = jnp.exp(-tg / jnp.exp(1.0))
    a2 = a2 / a2.sum(-1)                                               # torch broadcast
    out1 = jnp.einsum('bhij,bhjd->bhid', attn1, v)
    out2 = jnp.einsum('ij,bhjd->bhid', a2, t)
    out = jnp.concatenate([out1, out2], axis=-1)                       # (B, H, N, 2*Dh)
    out = out.transpose(0, 2, 1, 3).reshape(b, n, 2 * heads * dim_head)
    return out @ w_out + b_out


if __name__ == "__main__":
    B, N, DIM = 2, 16, 32
    HEADS, DIM_HEAD = 4, 16
    INNER = HEADS * DIM_HEAD

    key = jax.random.PRNGKey(0)
    kx, kq, kw, kb = jax.random.split(key, 4)
    x = jax.random.normal(kx, (B, N, DIM), dtype=jnp.float32)
    # Deterministic synthetic weights (stored as (in, out), equivalent to W.T)
    w_qkv = jax.random.normal(kq, (DIM, 4 * INNER), dtype=jnp.float32) * (DIM ** -0.5)
    w_out = jax.random.normal(kw, (2 * INNER, DIM), dtype=jnp.float32) * ((2 * INNER) ** -0.5)
    b_out = jax.random.normal(kb, (1, DIM), dtype=jnp.float32) * 0.01

    # One-time host-side prep (fused weights + positional kernel), reused per call.
    params = prepare_attention_params(
        w_qkv, w_out, b_out, heads=HEADS, dim_head=DIM_HEAD, n=N,
        compute_dtype=jnp.bfloat16)

    y = attention_forward(x, params)
    y = jax.block_until_ready(y)

    y_ref = attention_reference(x, w_qkv, w_out, b_out, heads=HEADS, dim_head=DIM_HEAD)
    # Tolerance covers bf16 MXU operands (f32 accumulation), the approx (EUP)
    # softmax reciprocal, and host-side weight fusion (fp reassociation of
    # mathematically identical linear algebra).
    assert jnp.allclose(y, y_ref, atol=2e-2, rtol=2e-2), "mismatch vs reference"
    print("KERNEL_OK")
</pallas_src>

<mosaic_0001>
module attributes {stable_mosaic.version = 11 : i64} {
  func.func @_attention_kernel(%arg0: i32, %arg1: memref<2x16x32xf32, #tpu.memory_space<vmem>>, %arg2: memref<32x288xbf16, #tpu.memory_space<vmem>>, %arg3: memref<16x16xbf16, #tpu.memory_space<vmem>>, %arg4: memref<1x32xf32, #tpu.memory_space<vmem>>, %arg5: memref<2x16x32xf32, #tpu.memory_space<vmem>>) attributes {dimension_semantics = [#tpu.dimension_semantics<arbitrary>], iteration_bounds = array<i64: 1>, scalar_prefetch = 0 : i64, scratch_operands = 0 : i64, tpu.core_type = #tpu.core_type<tc>, window_params = [{transform_indices = @transform_0, window_bounds = array<i64: 2, 16, 32>}, {pipeline_mode = #tpu.pipeline_mode<synchronous>, transform_indices = @transform_1, window_bounds = array<i64: 32, 288>}, {pipeline_mode = #tpu.pipeline_mode<synchronous>, transform_indices = @transform_2, window_bounds = array<i64: 16, 16>}, {pipeline_mode = #tpu.pipeline_mode<synchronous>, transform_indices = @transform_3, window_bounds = array<i64: 1, 32>}, {transform_indices = @transform_4, window_bounds = array<i64: 2, 16, 32>}]} {
    %c0 = arith.constant 0 : index
    %c0_0 = arith.constant 0 : index
    %c0_1 = arith.constant 0 : index
    %0 = vector.load %arg1[%c0, %c0_0, %c0_1] : memref<2x16x32xf32, #tpu.memory_space<vmem>>, vector<2x16x32xf32>
    %1 = vector.shape_cast %0 : vector<2x16x32xf32> to vector<32x32xf32>
    %2 = arith.truncf %1 : vector<32x32xf32> to vector<32x32xbf16>
    %c0_2 = arith.constant 0 : index
    %c0_3 = arith.constant 0 : index
    %3 = vector.load %arg2[%c0_2, %c0_3] : memref<32x288xbf16, #tpu.memory_space<vmem>>, vector<32x288xbf16>
    %cst = arith.constant dense<0.000000e+00> : vector<32x288xf32>
    %4 = tpu.matmul %2, %3, %cst {dimension_numbers = #tpu.dot_dimension_numbers<[1], [0], [0], [1], [0, 0, 1, 1], [], []>} : vector<32x32xbf16>, vector<32x288xbf16>, vector<32x288xf32> -> vector<32x288xf32>
    %5 = vector.extract_strided_slice %4 {offsets = [0, 64], sizes = [32, 64], strides = [1, 1]} : vector<32x288xf32> to vector<32x64xf32>
    %6 = tpu.transpose %5, [1, 0] : vector<32x64xf32> -> vector<64x32xf32>
    %7 = arith.truncf %6 : vector<64x32xf32> to vector<64x32xbf16>
    %8 = arith.truncf %4 : vector<32x288xf32> to vector<32x288xbf16>
    %c0_4 = arith.constant 0 : index
    %c0_5 = arith.constant 0 : index
    %9 = vector.load %arg3[%c0_4, %c0_5] : memref<16x16xbf16, #tpu.memory_space<vmem>>, vector<16x16xbf16>
    %c0_6 = arith.constant 0 : index
    %c0_7 = arith.constant 0 : index
    %10 = vector.load %arg4[%c0_6, %c0_7] : memref<1x32xf32, #tpu.memory_space<vmem>>, vector<1x32xf32>
    %11 = vector.extract_strided_slice %8 {offsets = [0, 256], sizes = [16, 32], strides = [1, 1]} : vector<32x288xbf16> to vector<16x32xbf16>
    %cst_8 = arith.constant dense<0.000000e+00> : vector<16x32xf32>
    %12 = tpu.matmul %9, %11, %cst_8 {dimension_numbers = #tpu.dot_dimension_numbers<[1], [0], [0], [1], [0, 0, 1, 1], [], []>} : vector<16x16xbf16>, vector<16x32xbf16>, vector<16x32xf32> -> vector<16x32xf32>
    %13 = vector.extract_strided_slice %8 {offsets = [0, 0], sizes = [16, 16], strides = [1, 1]} : vector<32x288xbf16> to vector<16x16xbf16>
    %14 = vector.extract_strided_slice %7 {offsets = [0, 0], sizes = [16, 16], strides = [1, 1]} : vector<64x32xbf16> to vector<16x16xbf16>
    %cst_9 = arith.constant dense<0.000000e+00> : vector<16x16xf32>
    %15 = tpu.matmul %13, %14, %cst_9 {dimension_numbers = #tpu.dot_dimension_numbers<[1], [0], [0], [1], [0, 0, 1, 1], [], []>} : vector<16x16xbf16>, vector<16x16xbf16>, vector<16x16xf32> -> vector<16x16xf32>
    %cst_10 = arith.constant dense<0xFF800000> : vector<16xf32>
    %16 = vector.multi_reduction <maximumf>, %15, %cst_10 [1] : vector<16x16xf32> to vector<16xf32>
    %17 = vector.shape_cast %16 : vector<16xf32> to vector<16x1xf32>
    %18 = vector.broadcast %17 : vector<16x1xf32> to vector<16x16xf32>
    %19 = arith.subf %15, %18 : vector<16x16xf32>
    %20 = math.exp %19 : vector<16x16xf32>
    %cst_11 = arith.constant dense<0.000000e+00> : vector<16xf32>
    %21 = vector.multi_reduction <add>, %20, %cst_11 [1] : vector<16x16xf32> to vector<16xf32>
    %22 = vector.shape_cast %21 : vector<16xf32> to vector<16x1xf32>
    %23 = tpu.reciprocal %22 {approx = true} : vector<16x1xf32> -> vector<16x1xf32>
    %24 = vector.broadcast %23 : vector<16x1xf32> to vector<16x16xf32>
    %25 = arith.mulf %20, %24 : vector<16x16xf32>
    %26 = vector.extract_strided_slice %8 {offsets = [0, 128], sizes = [16, 32], strides = [1, 1]} : vector<32x288xbf16> to vector<16x32xbf16>
    %27 = arith.truncf %25 : vector<16x16xf32> to vector<16x16xbf16>
    %cst_12 = arith.constant dense<0.000000e+00> : vector<16x32xf32>
    %28 = tpu.matmul %27, %26, %cst_12 {dimension_numbers = #tpu.dot_dimension_numbers<[1], [0], [0], [1], [0, 0, 1, 1], [], []>} : vector<16x16xbf16>, vector<16x32xbf16>, vector<16x32xf32> -> vector<16x32xf32>
    %29 = arith.addf %12, %28 : vector<16x32xf32>
    %30 = vector.extract_strided_slice %8 {offsets = [0, 16], sizes = [16, 16], strides = [1, 1]} : vector<32x288xbf16> to vector<16x16xbf16>
    %31 = vector.extract_strided_slice %7 {offsets = [16, 0], sizes = [16, 16], strides = [1, 1]} : vector<64x32xbf16> to vector<16x16xbf16>
    %cst_13 = arith.constant dense<0.000000e+00> : vector<16x16xf32>
    %32 = tpu.matmul %30, %31, %cst_13 {dimension_numbers = #tpu.dot_dimension_numbers<[1], [0], [0], [1], [0, 0, 1, 1], [], []>} : vector<16x16xbf16>, vector<16x16xbf16>, vector<16x16xf32> -> vector<16x16xf32>
    %cst_14 = arith.constant dense<0xFF800000> : vector<16xf32>
    %33 = vector.multi_reduction <maximumf>, %32, %cst_14 [1] : vector<16x16xf32> to vector<16xf32>
    %34 = vector.shape_cast %33 : vector<16xf32> to vector<16x1xf32>
    %35 = vector.broadcast %34 : vector<16x1xf32> to vector<16x16xf32>
    %36 = arith.subf %32, %35 : vector<16x16xf32>
    %37 = math.exp %36 : vector<16x16xf32>
    %cst_15 = arith.constant dense<0.000000e+00> : vector<16xf32>
    %38 = vector.multi_reduction <add>, %37, %cst_15 [1] : vector<16x16xf32> to vector<16xf32>
    %39 = vector.shape_cast %38 : vector<16xf32> to vector<16x1xf32>
    %40 = tpu.reciprocal %39 {approx = true} : vector<16x1xf32> -> vector<16x1xf32>
    %41 = vector.broadcast %40 : vector<16x1xf32> to vector<16x16xf32>
    %42 = arith.mulf %37, %41 : vector<16x16xf32>
    %43 = vector.extract_strided_slice %8 {offsets = [0, 160], sizes = [16, 32], strides = [1, 1]} : vector<32x288xbf16> to vector<16x32xbf16>
    %44 = arith.truncf %42 : vector<16x16xf32> to vector<16x16xbf16>
    %cst_16 = arith.constant dense<0.000000e+00> : vector<16x32xf32>
    %45 = tpu.matmul %44, %43, %cst_16 {dimension_numbers = #tpu.dot_dimension_numbers<[1], [0], [0], [1], [0, 0, 1, 1], [], []>} : vector<16x16xbf16>, vector<16x32xbf16>, vector<16x32xf32> -> vector<16x32xf32>
    %46 = arith.addf %29, %45 : vector<16x32xf32>
    %47 = vector.extract_strided_slice %8 {offsets = [0, 32], sizes = [16, 16], strides = [1, 1]} : vector<32x288xbf16> to vector<16x16xbf16>
    %48 = vector.extract_strided_slice %7 {offsets = [32, 0], sizes = [16, 16], strides = [1, 1]} : vector<64x32xbf16> to vector<16x16xbf16>
    %cst_17 = arith.constant dense<0.000000e+00> : vector<16x16xf32>
    %49 = tpu.matmul %47, %48, %cst_17 {dimension_numbers = #tpu.dot_dimension_numbers<[1], [0], [0], [1], [0, 0, 1, 1], [], []>} : vector<16x16xbf16>, vector<16x16xbf16>, vector<16x16xf32> -> vector<16x16xf32>
    %cst_18 = arith.constant dense<0xFF800000> : vector<16xf32>
    %50 = vector.multi_reduction <maximumf>, %49, %cst_18 [1] : vector<16x16xf32> to vector<16xf32>
    %51 = vector.shape_cast %50 : vector<16xf32> to vector<16x1xf32>
    %52 = vector.broadcast %51 : vector<16x1xf32> to vector<16x16xf32>
    %53 = arith.subf %49, %52 : vector<16x16xf32>
    %54 = math.exp %53 : vector<16x16xf32>
    %cst_19 = arith.constant dense<0.000000e+00> : vector<16xf32>
    %55 = vector.multi_reduction <add>, %54, %cst_19 [1] : vector<16x16xf32> to vector<16xf32>
    %56 = vector.shape_cast %55 : vector<16xf32> to vector<16x1xf32>
    %57 = tpu.reciprocal %56 {approx = true} : vector<16x1xf32> -> vector<16x1xf32>
    %58 = vector.broadcast %57 : vector<16x1xf32> to vector<16x16xf32>
    %59 = arith.mulf %54, %58 : vector<16x16xf32>
    %60 = vector.extract_strided_slice %8 {offsets = [0, 192], sizes = [16, 32], strides = [1, 1]} : vector<32x288xbf16> to vector<16x32xbf16>
    %61 = arith.truncf %59 : vector<16x16xf32> to vector<16x16xbf16>
    %cst_20 = arith.constant dense<0.000000e+00> : vector<16x32xf32>
    %62 = tpu.matmul %61, %60, %cst_20 {dimension_numbers = #tpu.dot_dimension_numbers<[1], [0], [0], [1], [0, 0, 1, 1], [], []>} : vector<16x16xbf16>, vector<16x32xbf16>, vector<16x32xf32> -> vector<16x32xf32>
    %63 = arith.addf %46, %62 : vector<16x32xf32>
    %64 = vector.extract_strided_slice %8 {offsets = [0, 48], sizes = [16, 16], strides = [1, 1]} : vector<32x288xbf16> to vector<16x16xbf16>
    %65 = vector.extract_strided_slice %7 {offsets = [48, 0], sizes = [16, 16], strides = [1, 1]} : vector<64x32xbf16> to vector<16x16xbf16>
    %cst_21 = arith.constant dense<0.000000e+00> : vector<16x16xf32>
    %66 = tpu.matmul %64, %65, %cst_21 {dimension_numbers = #tpu.dot_dimension_numbers<[1], [0], [0], [1], [0, 0, 1, 1], [], []>} : vector<16x16xbf16>, vector<16x16xbf16>, vector<16x16xf32> -> vector<16x16xf32>
    %cst_22 = arith.constant dense<0xFF800000> : vector<16xf32>
    %67 = vector.multi_reduction <maximumf>, %66, %cst_22 [1] : vector<16x16xf32> to vector<16xf32>
    %68 = vector.shape_cast %67 : vector<16xf32> to vector<16x1xf32>
    %69 = vector.broadcast %68 : vector<16x1xf32> to vector<16x16xf32>
    %70 = arith.subf %66, %69 : vector<16x16xf32>
    %71 = math.exp %70 : vector<16x16xf32>
    %cst_23 = arith.constant dense<0.000000e+00> : vector<16xf32>
    %72 = vector.multi_reduction <add>, %71, %cst_23 [1] : vector<16x16xf32> to vector<16xf32>
    %73 = vector.shape_cast %72 : vector<16xf32> to vector<16x1xf32>
    %74 = tpu.reciprocal %73 {approx = true} : vector<16x1xf32> -> vector<16x1xf32>
    %75 = vector.broadcast %74 : vector<16x1xf32> to vector<16x16xf32>
    %76 = arith.mulf %71, %75 : vector<16x16xf32>
    %77 = vector.extract_strided_slice %8 {offsets = [0, 224], sizes = [16, 32], strides = [1, 1]} : vector<32x288xbf16> to vector<16x32xbf16>
    %78 = arith.truncf %76 : vector<16x16xf32> to vector<16x16xbf16>
    %cst_24 = arith.constant dense<0.000000e+00> : vector<16x32xf32>
    %79 = tpu.matmul %78, %77, %cst_24 {dimension_numbers = #tpu.dot_dimension_numbers<[1], [0], [0], [1], [0, 0, 1, 1], [], []>} : vector<16x16xbf16>, vector<16x32xbf16>, vector<16x32xf32> -> vector<16x32xf32>
    %80 = arith.addf %63, %79 : vector<16x32xf32>
    %81 = vector.broadcast %10 : vector<1x32xf32> to vector<16x32xf32>
    %82 = arith.addf %80, %81 : vector<16x32xf32>
    %c0_25 = arith.constant 0 : index
    %c0_26 = arith.constant 0 : index
    %c0_27 = arith.constant 0 : index
    %83 = vector.load %arg5[%c0_25, %c0_26, %c0_27] : memref<2x16x32xf32, #tpu.memory_space<vmem>>, vector<1x16x32xf32>
    %84 = vector.shape_cast %83 : vector<1x16x32xf32> to vector<16x32xf32>
    %85 = vector.shape_cast %82 : vector<16x32xf32> to vector<1x16x32xf32>
    tpu.vector_store %arg5[%c0_25, %c0_26, %c0_27], %85 {strides = array<i32>} : memref<2x16x32xf32, #tpu.memory_space<vmem>>, vector<1x16x32xf32>,
    %86 = vector.extract_strided_slice %8 {offsets = [16, 256], sizes = [16, 32], strides = [1, 1]} : vector<32x288xbf16> to vector<16x32xbf16>
    %cst_28 = arith.constant dense<0.000000e+00> : vector<16x32xf32>
    %87 = tpu.matmul %9, %86, %cst_28 {dimension_numbers = #tpu.dot_dimension_numbers<[1], [0], [0], [1], [0, 0, 1, 1], [], []>} : vector<16x16xbf16>, vector<16x32xbf16>, vector<16x32xf32> -> vector<16x32xf32>
    %88 = vector.extract_strided_slice %8 {offsets = [16, 0], sizes = [16, 16], strides = [1, 1]} : vector<32x288xbf16> to vector<16x16xbf16>
    %89 = vector.extract_strided_slice %7 {offsets = [0, 16], sizes = [16, 16], strides = [1, 1]} : vector<64x32xbf16> to vector<16x16xbf16>
    %cst_29 = arith.constant dense<0.000000e+00> : vector<16x16xf32>
    %90 = tpu.matmul %88, %89, %cst_29 {dimension_numbers = #tpu.dot_dimension_numbers<[1], [0], [0], [1], [0, 0, 1, 1], [], []>} : vector<16x16xbf16>, vector<16x16xbf16>, vector<16x16xf32> -> vector<16x16xf32>
    %cst_30 = arith.constant dense<0xFF800000> : vector<16xf32>
    %91 = vector.multi_reduction <maximumf>, %90, %cst_30 [1] : vector<16x16xf32> to vector<16xf32>
    %92 = vector.shape_cast %91 : vector<16xf32> to vector<16x1xf32>
    %93 = vector.broadcast %92 : vector<16x1xf32> to vector<16x16xf32>
    %94 = arith.subf %90, %93 : vector<16x16xf32>
    %95 = math.exp %94 : vector<16x16xf32>
    %cst_31 = arith.constant dense<0.000000e+00> : vector<16xf32>
    %96 = vector.multi_reduction <add>, %95, %cst_31 [1] : vector<16x16xf32> to vector<16xf32>
    %97 = vector.shape_cast %96 : vector<16xf32> to vector<16x1xf32>
    %98 = tpu.reciprocal %97 {approx = true} : vector<16x1xf32> -> vector<16x1xf32>
    %99 = vector.broadcast %98 : vector<16x1xf32> to vector<16x16xf32>
    %100 = arith.mulf %95, %99 : vector<16x16xf32>
    %101 = vector.extract_strided_slice %8 {offsets = [16, 128], sizes = [16, 32], strides = [1, 1]} : vector<32x288xbf16> to vector<16x32xbf16>
    %102 = arith.truncf %100 : vector<16x16xf32> to vector<16x16xbf16>
    %cst_32 = arith.constant dense<0.000000e+00> : vector<16x32xf32>
    %103 = tpu.matmul %102, %101, %cst_32 {dimension_numbers = #tpu.dot_dimension_numbers<[1], [0], [0], [1], [0, 0, 1, 1], [], []>} : vector<16x16xbf16>, vector<16x32xbf16>, vector<16x32xf32> -> vector<16x32xf32>
    %104 = arith.addf %87, %103 : vector<16x32xf32>
    %105 = vector.extract_strided_slice %8 {offsets = [16, 16], sizes = [16, 16], strides = [1, 1]} : vector<32x288xbf16> to vector<16x16xbf16>
    %106 = vector.extract_strided_slice %7 {offsets = [16, 16], sizes = [16, 16], strides = [1, 1]} : vector<64x32xbf16> to vector<16x16xbf16>
    %cst_33 = arith.constant dense<0.000000e+00> : vector<16x16xf32>
    %107 = tpu.matmul %105, %106, %cst_33 {dimension_numbers = #tpu.dot_dimension_numbers<[1], [0], [0], [1], [0, 0, 1, 1], [], []>} : vector<16x16xbf16>, vector<16x16xbf16>, vector<16x16xf32> -> vector<16x16xf32>
    %cst_34 = arith.constant dense<0xFF800000> : vector<16xf32>
    %108 = vector.multi_reduction <maximumf>, %107, %cst_34 [1] : vector<16x16xf32> to vector<16xf32>
    %109 = vector.shape_cast %108 : vector<16xf32> to vector<16x1xf32>
    %110 = vector.broadcast %109 : vector<16x1xf32> to vector<16x16xf32>
    %111 = arith.subf %107, %110 : vector<16x16xf32>
    %112 = math.exp %111 : vector<16x16xf32>
    %cst_35 = arith.constant dense<0.000000e+00> : vector<16xf32>
    %113 = vector.multi_reduction <add>, %112, %cst_35 [1] : vector<16x16xf32> to vector<16xf32>
    %114 = vector.shape_cast %113 : vector<16xf32> to vector<16x1xf32>
    %115 = tpu.reciprocal %114 {approx = true} : vector<16x1xf32> -> vector<16x1xf32>
    %116 = vector.broadcast %115 : vector<16x1xf32> to vector<16x16xf32>
    %117 = arith.mulf %112, %116 : vector<16x16xf32>
    %118 = vector.extract_strided_slice %8 {offsets = [16, 160], sizes = [16, 32], strides = [1, 1]} : vector<32x288xbf16> to vector<16x32xbf16>
    %119 = arith.truncf %117 : vector<16x16xf32> to vector<16x16xbf16>
    %cst_36 = arith.constant dense<0.000000e+00> : vector<16x32xf32>
    %120 = tpu.matmul %119, %118, %cst_36 {dimension_numbers = #tpu.dot_dimension_numbers<[1], [0], [0], [1], [0, 0, 1, 1], [], []>} : vector<16x16xbf16>, vector<16x32xbf16>, vector<16x32xf32> -> vector<16x32xf32>
    %121 = arith.addf %104, %120 : vector<16x32xf32>
    %122 = vector.extract_strided_slice %8 {offsets = [16, 32], sizes = [16, 16], strides = [1, 1]} : vector<32x288xbf16> to vector<16x16xbf16>
    %123 = vector.extract_strided_slice %7 {offsets = [32, 16], sizes = [16, 16], strides = [1, 1]} : vector<64x32xbf16> to vector<16x16xbf16>
    %cst_37 = arith.constant dense<0.000000e+00> : vector<16x16xf32>
    %124 = tpu.matmul %122, %123, %cst_37 {dimension_numbers = #tpu.dot_dimension_numbers<[1], [0], [0], [1], [0, 0, 1, 1], [], []>} : vector<16x16xbf16>, vector<16x16xbf16>, vector<16x16xf32> -> vector<16x16xf32>
    %cst_38 = arith.constant dense<0xFF800000> : vector<16xf32>
    %125 = vector.multi_reduction <maximumf>, %124, %cst_38 [1] : vector<16x16xf32> to vector<16xf32>
    %126 = vector.shape_cast %125 : vector<16xf32> to vector<16x1xf32>
    %127 = vector.broadcast %126 : vector<16x1xf32> to vector<16x16xf32>
    %128 = arith.subf %124, %127 : vector<16x16xf32>
    %129 = math.exp %128 : vector<16x16xf32>
    %cst_39 = arith.constant dense<0.000000e+00> : vector<16xf32>
    %130 = vector.multi_reduction <add>, %129, %cst_39 [1] : vector<16x16xf32> to vector<16xf32>
    %131 = vector.shape_cast %130 : vector<16xf32> to vector<16x1xf32>
    %132 = tpu.reciprocal %131 {approx = true} : vector<16x1xf32> -> vector<16x1xf32>
    %133 = vector.broadcast %132 : vector<16x1xf32> to vector<16x16xf32>
    %134 = arith.mulf %129, %133 : vector<16x16xf32>
    %135 = vector.extract_strided_slice %8 {offsets = [16, 192], sizes = [16, 32], strides = [1, 1]} : vector<32x288xbf16> to vector<16x32xbf16>
    %136 = arith.truncf %134 : vector<16x16xf32> to vector<16x16xbf16>
    %cst_40 = arith.constant dense<0.000000e+00> : vector<16x32xf32>
    %137 = tpu.matmul %136, %135, %cst_40 {dimension_numbers = #tpu.dot_dimension_numbers<[1], [0], [0], [1], [0, 0, 1, 1], [], []>} : vector<16x16xbf16>, vector<16x32xbf16>, vector<16x32xf32> -> vector<16x32xf32>
    %138 = arith.addf %121, %137 : vector<16x32xf32>
    %139 = vector.extract_strided_slice %8 {offsets = [16, 48], sizes = [16, 16], strides = [1, 1]} : vector<32x288xbf16> to vector<16x16xbf16>
    %140 = vector.extract_strided_slice %7 {offsets = [48, 16], sizes = [16, 16], strides = [1, 1]} : vector<64x32xbf16> to vector<16x16xbf16>
    %cst_41 = arith.constant dense<0.000000e+00> : vector<16x16xf32>
    %141 = tpu.matmul %139, %140, %cst_41 {dimension_numbers = #tpu.dot_dimension_numbers<[1], [0], [0], [1], [0, 0, 1, 1], [], []>} : vector<16x16xbf16>, vector<16x16xbf16>, vector<16x16xf32> -> vector<16x16xf32>
    %cst_42 = arith.constant dense<0xFF800000> : vector<16xf32>
    %142 = vector.multi_reduction <maximumf>, %141, %cst_42 [1] : vector<16x16xf32> to vector<16xf32>
    %143 = vector.shape_cast %142 : vector<16xf32> to vector<16x1xf32>
    %144 = vector.broadcast %143 : vector<16x1xf32> to vector<16x16xf32>
    %145 = arith.subf %141, %144 : vector<16x16xf32>
    %146 = math.exp %145 : vector<16x16xf32>
    %cst_43 = arith.constant dense<0.000000e+00> : vector<16xf32>
    %147 = vector.multi_reduction <add>, %146, %cst_43 [1] : vector<16x16xf32> to vector<16xf32>
    %148 = vector.shape_cast %147 : vector<16xf32> to vector<16x1xf32>
    %149 = tpu.reciprocal %148 {approx = true} : vector<16x1xf32> -> vector<16x1xf32>
    %150 = vector.broadcast %149 : vector<16x1xf32> to vector<16x16xf32>
    %151 = arith.mulf %146, %150 : vector<16x16xf32>
    %152 = vector.extract_strided_slice %8 {offsets = [16, 224], sizes = [16, 32], strides = [1, 1]} : vector<32x288xbf16> to vector<16x32xbf16>
    %153 = arith.truncf %151 : vector<16x16xf32> to vector<16x16xbf16>
    %cst_44 = arith.constant dense<0.000000e+00> : vector<16x32xf32>
    %154 = tpu.matmul %153, %152, %cst_44 {dimension_numbers = #tpu.dot_dimension_numbers<[1], [0], [0], [1], [0, 0, 1, 1], [], []>} : vector<16x16xbf16>, vector<16x32xbf16>, vector<16x32xf32> -> vector<16x32xf32>
    %155 = arith.addf %138, %154 : vector<16x32xf32>
    %156 = vector.broadcast %10 : vector<1x32xf32> to vector<16x32xf32>
    %157 = arith.addf %155, %156 : vector<16x32xf32>
    %c1 = arith.constant 1 : index
    %c0_45 = arith.constant 0 : index
    %c0_46 = arith.constant 0 : index
    %158 = vector.load %arg5[%c1, %c0_45, %c0_46] : memref<2x16x32xf32, #tpu.memory_space<vmem>>, vector<1x16x32xf32>
    %159 = vector.shape_cast %158 : vector<1x16x32xf32> to vector<16x32xf32>
    %160 = vector.shape_cast %157 : vector<16x32xf32> to vector<1x16x32xf32>
    tpu.vector_store %arg5[%c1, %c0_45, %c0_46], %160 {strides = array<i32>} : memref<2x16x32xf32, #tpu.memory_space<vmem>>, vector<1x16x32xf32>,
    return
  }
  func.func @transform_0(%arg0: i32) -> (i32, i32, i32) {
    %c0_i32 = arith.constant 0 : i32
    %c0_i32_0 = arith.constant 0 : i32
    %c0_i32_1 = arith.constant 0 : i32
    return %arg0, %c0_i32, %c0_i32_0 : i32, i32, i32
  }
  func.func @transform_1(%arg0: i32) -> (i32, i32) {
    %c0_i32 = arith.constant 0 : i32
    %c0_i32_0 = arith.constant 0 : i32
    %c0_i32_1 = arith.constant 0 : i32
    return %c0_i32, %c0_i32_0 : i32, i32
  }
  func.func @transform_2(%arg0: i32) -> (i32, i32) {
    %c0_i32 = arith.constant 0 : i32
    %c0_i32_0 = arith.constant 0 : i32
    %c0_i32_1 = arith.constant 0 : i32
    return %c0_i32, %c0_i32_0 : i32, i32
  }
  func.func @transform_3(%arg0: i32) -> (i32, i32) {
    %c0_i32 = arith.constant 0 : i32
    %c0_i32_0 = arith.constant 0 : i32
    %c0_i32_1 = arith.constant 0 : i32
    return %c0_i32, %c0_i32_0 : i32, i32
  }
  func.func @transform_4(%arg0: i32) -> (i32, i32, i32) {
    %c0_i32 = arith.constant 0 : i32
    %c0_i32_0 = arith.constant 0 : i32
    %c0_i32_1 = arith.constant 0 : i32
    return %arg0, %c0_i32, %c0_i32_0 : i32, i32, i32
  }
}

</mosaic_0001>

<bundles_post_ra>
// kernel: tpu_custom_call.1
= control target key start
LH: loop header
LB: loop body
LE: loop exit
PB: predicated region body
PF: predicated region fallthrough
CT: control target
= control target key end

     0   :  { %9 = vsyncpa [#allocation3], 0  ;;  %s2002_s0 = inlined_call_operand.hbm [shape: f32[2,16,32], index: 0, kind: input, shape index: {}]   ;;  %s2003_s1 = inlined_call_operand.hbm [shape: bf16[32,288], index: 1, kind: input, shape index: {}]   ;;  %s2004_s2 = inlined_call_operand.hbm [shape: bf16[16,16], index: 2, kind: input, shape index: {}]   ;;  %s2005_s3 = inlined_call_operand.vmem [shape: f32[1,32], index: 3, kind: input, shape index: {}]   ;;  %s2006_s4 = inlined_call_operand.hbm [shape: f32[2,16,32], index: 4, kind: output, shape index: {}]  }
   0x1   :  { %10 = vsyncpa [#allocation6], 0 }
   0x2   :  { %11 = vsyncpa [#allocation4], 0  ;;  %s1712_s15 = smov [#allocation5]  }
   0x3   :  { %s29_s16 = sshll.u32 %s1712_s15, 4  ;;  %s30_s16 = int_to_ptr.vmem [resolvable:$true] %s29_s16 }
   0x4   :  { %s1634_s17 = scalar_lea.vmem %s30_s16, 768  ;;  %p1639_p1 = scmp.lt.s32.totalorder %s30_s16, %s30_s16 }
   0x5   :  { %p1635_p0 = scmp.ne.s32.totalorder %s30_s16, %s1634_s17  ;;  %p1640_p2 = scmp.lt.s32.totalorder %s1634_s17, %s1634_s17 }
   0x7   :  { %p1641_p3 = por %p1640_p2, %p1639_p1 }
   0x9   :  { %p1642_p4 = pnand %p1641_p3, %p1635_p0 }
   0xb   :  { %1645 = shalt.err (!%p1642_p4)
}
   0xc   :  { %s1713_s18 = smov 192   ;;  %s1714_s19 = smov 12  }
   0xd   :  { %35 = dma.hbm_to_vmem [thread:$0]  %s2003_s1, 768, %s30_s16, [#allocation6], %s1713_s18, %s1713_s18, %s1714_s19  }
   0xe   :  { %s1715_s22 = smov [#allocation2]  }
   0xf   :  { %s17_s23 = sshll.u32 %s1715_s22, 4  ;;  %s18_s23 = int_to_ptr.vmem [resolvable:$true] %s17_s23 }
  0x10   :  { %s1654_s24 = scalar_lea.vmem %s18_s23, 512  ;;  %p1659_p6 = scmp.lt.s32.totalorder %s18_s23, %s18_s23 }
  0x11   :  { %p1655_p5 = scmp.ne.s32.totalorder %s18_s23, %s1654_s24  ;;  %p1660_p7 = scmp.lt.s32.totalorder %s1654_s24, %s1654_s24 }
  0x13   :  { %p1661_p8 = por %p1660_p7, %p1659_p6 }
  0x15   :  { %p1662_p9 = pnand %p1661_p8, %p1655_p5 }
  0x17   :  { %1665 = shalt.err (!%p1662_p9)
}
  0x18   :  { %s1716_s25 = smov 128   ;;  %s1717_s26 = smov 8  }
  0x19   :  { %23 = dma.hbm_to_vmem [thread:$0]  %s2002_s0, 512, %s18_s23, [#allocation3], %s1716_s25, %s1716_s25, %s1717_s26  }
  0x1a   :  { %s1718_s1 = smov [#allocation7]  }
  0x1b   :  { %s41_s29 = sshll.u32 %s1718_s1, 4  ;;  %s42_s29 = int_to_ptr.vmem [resolvable:$true] %s41_s29 }
  0x1c   :  { %s1674_s30 = scalar_lea.vmem %s42_s29, 128  ;;  %p1679_p11 = scmp.lt.s32.totalorder %s42_s29, %s42_s29 }
  0x1d   :  { %p1675_p10 = scmp.ne.s32.totalorder %s42_s29, %s1674_s30  ;;  %p1680_p12 = scmp.lt.s32.totalorder %s1674_s30, %s1674_s30 }
  0x1f   :  { %p1681_p13 = por %p1680_p12, %p1679_p11 }
  0x21   :  { %p1682_p0 = pnand %p1681_p13, %p1675_p10 }
  0x23   :  { %1685 = shalt.err (!%p1682_p0)
}
  0x24   :  { %s1719_s5 = smov 64   ;;  %s1720_s6 = smov 4  }
  0x25   :  { %47 = dma.hbm_to_vmem [thread:$0]  %s2004_s2, 128, %s42_s29, [#allocation6], %s1719_s5, %s1719_s5, %s1720_s6  }
  0x26   :  { %1706 = dma.done.wait [#allocation3], 512  }
  0x27   :  { %1707 = vsyncadd [#allocation3], 4294966784 }
  0x28   :  { %1708 = dma.done.wait [#allocation6], 896  }
  0x29   :  { %1709 = vsyncadd [#allocation6], 4294966400  ;;  %v1721_v0 = vmov 0   ;;  %v1553_v1 = vld [vmem:[#allocation5 + $0x1c] ss:$12 sps:$4 sm:$0xff]   ;;  %v60_v4 = vld [vmem:[#allocation2] sm:$0xff] }
  0x2a   :  { %145 = vmatprep.mubr.bf16.mxu0 %v1721_v0  ;;  %v1555_v2 = vld [vmem:[#allocation5 + $0x18] ss:$12 sps:$4 sm:$0xff]   ;;  %125 = vmatprep.subr.bf16.mxu0 %v1553_v1  ;;  %v1558_v5 = vld [vmem:[#allocation5] ss:$12 sps:$4 sm:$0xff]   ;;  %vm106_vm0 = vcmask 261120   ;;  %v62_v8 = vld [vmem:[#allocation2 + $0x10] sm:$0xff] }
  0x2b   :  { %v1556_v3 = vld [vmem:[#allocation5 + $0x4] ss:$12 sps:$4 sm:$0xff]   ;;  %126 = vmatpush1.bf16.msra.mxu0 %v1555_v2  ;;  %v61_v6 = vld [vmem:[#allocation2 + $0x8] sm:$0xff]  ;;  %v63_v9 = vld [vmem:[#allocation2 + $0x18] sm:$0xff]  ;;  %v1722_v11 = vmov 0.0   ;;  %vm1723_vm1 = vmmov 0  }
  0x2c   :  { %127 = vmatprep.subr.bf16.mxu0 %v1556_v3  ;;  %v64_v7 = vpack.c.bf16 %v61_v6, %v60_v4  ;;  %v65_v10 = vpack.c.bf16 %v63_v9, %v62_v8  ;;  %v1559_v13 = vld [vmem:[#allocation5 + $0x20] ss:$12 sps:$4 sm:$0xff]   ;;  %v1560_v14 = vld [vmem:[#allocation5 + $0x8] ss:$12 sps:$4 sm:$0xff]   ;;  %vm276_vm2 = vcmask 130048   ;;  %s1724_s0 = smov 112  }
  0x2d   :  { %1420 = vmatprep.subr.bf16.mxu1 %v1559_v13  ;;  %s1725_s2 = smov 96   ;;  %s1726_s9 = smov 80   ;;  %v1561_v53 = vld [vmem:[#allocation7] sm:$0xff]  }
  0x2e   :  { %1424 = vmatprep.mubr.msk.bf16.mxu1 %vm106_vm0, %v64_v7  ;;  %1421 = vmatpush3.bf16.msra.mxu1 %v1559_v13  ;;  %s1727_s10 = smov 32  }
  0x2f   :  { %128 = vmatpush1.bf16.msra.mxu0 %v1558_v5  ;;  %1422 = vmatprep.subr.bf16.mxu1 %v1560_v14 }
  0x30   :  { %1434 = vmatprep.subr.bf16.mxu0 %v1722_v11 }
  0x32   :  { %1356 = vmatmul.mubr.msk.bf16.vlgmr.msra.gmra.mxu0 %vm106_vm0, %v64_v7  ;;  %1423 = vmatpush3.bf16.msra.mxu1 %v1560_v14 }
  0x33   :  { %155 = vmatprep.mubr.bf16.mxu0 %v1721_v0  ;;  %1428 = vmatprep.subr.bf16.mxu1 %v1722_v11 }
  0x35   :  { %1425 = vmatmul.mubr.msk.bf16.vlgmr.msra.gmra.mxu1 %vm106_vm0, %v65_v10 }
  0x36   :  { %1430 = vmatprep.mubr.msk.bf16.mxu1 %vm1723_vm1, %v1722_v11 }
  0x3a   :  { %1357 = vmatmul.mubr.msk.bf16.gmra.mxu0 %vm106_vm0, %v65_v10 }
  0x3b   :  { %1436 = vmatprep.mubr.msk.bf16.mxu0 %vm1723_vm1, %v1722_v11 }
  0xf2   :  { %v147_v12 = vpop.f32.mrf.mxu0 }
  0xf3   :  { %219 = vrot.lane.b32.xlu0 %v147_v12, %s1719_s5 }
  0xf4   :  { %v149_v15 = vpop.f32.mrf.mxu0 }
  0xf5   :  { %v1792_v28 = vpop.f32.mrf.mxu1 }
  0xf6   :  { %v151_v16 = vpop.f32.mrf.mxu0 }
  0xf7   :  { %v1773_v17 = vpack.c.bf16 %v151_v16, %v147_v12  ;;  %221 = vrot.lane.b32.xlu0 %v151_v16, %s1719_s5  ;;  %v200_v29 = vpop.f32.mrf.mxu1 }
  0xf8   :  { %v153_v18 = vpop.f32.mrf.mxu0 }
  0xf9   :  { %v1776_v19 = vpack.c.bf16 %v153_v18, %v149_v15  ;;  %v1794_v30 = vpop.f32.mrf.mxu1 }
  0xfa   :  { %v157_v20 = vpop.f32.mrf.mxu0  ;;  %v272_v31 = vpack.c.bf16 %v1794_v30, %v1792_v28 }
  0xfb   :  { %1435 = vmatpush3.bf16.msra.mxu0 %v1776_v19  ;;  %223 = vrot.lane.b32.xlu1 %v157_v20, %s1719_s5  ;;  %v203_v34 = vpop.f32.mrf.mxu1 }
  0xfc   :  { %v1781_v21 = vpop.f32.mrf.mxu0  ;;  %1446 = vmatprep.subr.bf16.mxu0 %v1722_v11  ;;  %v269_v36 = vpack.c.bf16 %v203_v34, %v200_v29 }
  0xfe   :  { %v161_v22 = vpop.f32.mrf.mxu0 }
  0xff   :  { %v1785_v23 = vpack.c.bf16 %v161_v22, %v157_v20  ;;  %225 = vrot.lane.b32.xlu1 %v161_v22, %s1719_s5 }
 0x100   :  { %v1858_v15 = vpop.f32.mrf.mxu0 }
 0x165   :  { %v220_v24 = vpop.permute.xlu0 %219 }
 0x166   :  { %231 = vxpose.xlu0.b32.start [1/4] (short) (narrow) %v220_v24, 64 }
 0x169   :  { %v222_v25 = vpop.permute.xlu0 %221 }
 0x16a   :  { %232 = vxpose.xlu0.b32.cont [2/4] (short) (narrow) %v222_v25, 64 }
 0x16d   :  { %v224_v26 = vpop.permute.xlu1 %223 }
 0x16e   :  { %233 = vxpose.xlu0.b32.cont [3/4] (short) (narrow) %v224_v26, 64 }
 0x171   :  { %v226_v27 = vpop.permute.xlu1 %225 }
 0x172   :  { %234 = vxpose.xlu0.b32.end [4/4] (short) (narrow) %v226_v27, 64 }
 0x1e2   :  { %v247_v32 = vpop.trf.xlu0 }
 0x1e6   :  { %v248_v33 = vpop.trf.xlu0 }
 0x1e7   :  { %v263_v35 = vpack.c.bf16 %v248_v33, %v247_v32 }
 0x1e9   :  { %1429 = vmatpush3.bf16.msra.mxu1 %v263_v35 }
 0x1ea   :  { %1440 = vmatprep.subr.bf16.mxu1 %v1722_v11  ;;  %v249_v54 = vpop.trf.xlu0 }
 0x1ec   :  { %1431 = vmatmul.mubr.msk.bf16.vlgmr.msra.gmra.mxu1 %vm276_vm2, %v1773_v17 }
 0x1ed   :  { %1441 = vmatpush3.bf16.msra.mxu1 %v269_v36  ;;  %1442 = vmatprep.mubr.msk.bf16.mxu1 %vm1723_vm1, %v1722_v11 }
 0x1ee   :  { %1452 = vmatprep.subr.bf16.mxu1 %v1722_v11  ;;  %v250_v55 = vpop.trf.xlu0 }
 0x1ef   :  { %v1818_v3 = vpack.c.bf16 %v250_v55, %v249_v54 }
 0x1f2   :  { %v251_v56 = vpop.trf.xlu0 }
 0x1f4   :  { %1443 = vmatmul.mubr.msk.bf16.vlgmr.msra.gmra.mxu1 %vm276_vm2, %v1561_v53 }
 0x1f5   :  { %1454 = vmatprep.mubr.msk.bf16.mxu1 %vm1723_vm1, %v1722_v11 }
 0x1f6   :  { %v252_v57 = vpop.trf.xlu0 }
 0x1f7   :  { %v1825_v5 = vpack.c.bf16 %v252_v57, %v251_v56 }
 0x1fa   :  { %v253_v58 = vpop.trf.xlu0 }
 0x1fe   :  { %v254_v59 = vpop.trf.xlu0 }
 0x1ff   :  { %v1832_v7 = vpack.c.bf16 %v254_v59, %v253_v58 }
 0x2ac   :  { %v314_v37 = vpop.f32.mrf.mxu1 }
 0x2ad   :  { %v321_v38 = vsel %vm276_vm2, %v314_v37, -inf }
 0x2ae   :  { %322 = vmax.xlane.f32.xlu1 %v321_v38  ;;  %v1432_v39 = vpop.f32.mrf.mxu1 }
 0x2b0   :  { %v317_v40 = vpop.f32.mrf.mxu1 }
 0x2b1   :  { %v324_v41 = vsel %vm276_vm2, %v317_v40, -inf }
 0x2b2   :  { %325 = vmax.xlane.f32.xlu1 %v324_v41  ;;  %v1433_v42 = vpop.f32.mrf.mxu1 }
 0x2b4   :  { %v1854_v10 = vpop.f32.mrf.mxu1 }
 0x2b6   :  { %v1444_v12 = vpop.f32.mrf.mxu1 }
 0x2b8   :  { %v1856_v13 = vpop.f32.mrf.mxu1 }
 0x2ba   :  { %v1445_v14 = vpop.f32.mrf.mxu1 }
 0x337   :  { %v323_v43 = vpop.xlane.xlu1 %322 }
 0x338   :  { %v327_v44 = vsub.f32 %v314_v37, %v323_v43 }
 0x33a   :  { %v329_v45 = vmul.f32 1.442695, %v327_v44 }
 0x33b   :  { %v326_v46 = vpop.xlane.xlu1 %325 }
 0x33c   :  { %1562 = vpow2.f32 %v329_v45  ;;  %v328_v47 = vsub.f32 %v317_v40, %v326_v46 }
 0x33e   :  { %v331_v48 = vmul.f32 1.442695, %v328_v47 }
 0x340   :  { %1564 = vpow2.f32 %v331_v48 }
 0x349   :  { %v1563_v49 = vpop.eup %1562 }
 0x34a   :  { %v333_v50 = vsel %vm276_vm2, %v1563_v49, 0.0 }
 0x34b   :  { %334 = vadd.xlane.f32.xlu1 %v333_v50 }
 0x34d   :  { %v1565_v51 = vpop.eup %1564 }
 0x34e   :  { %v336_v52 = vsel %vm276_vm2, %v1565_v51, 0.0 }
 0x34f   :  { %337 = vadd.xlane.f32.xlu0 %v336_v52 }
 0x35c   :  { %438 = vrot.lane.b32.xlu1 %v1773_v17, %s1724_s0 }
 0x360   :  { %557 = vrot.lane.b32.xlu1 %v1773_v17, %s1725_s2 }
 0x364   :  { %675 = vrot.lane.b32.xlu1 %v1773_v17, %s1726_s9 }
 0x368   :  { %804 = vrot.lane.b32.xlu1 %v263_v35, %s1724_s0 }
 0x3d4   :  { %v335_v60 = vpop.xlane.xlu1 %334 }
 0x3d5   :  { %1566 = vrcp.f32 %v335_v60 }
 0x3d8   :  { %v338_v61 = vpop.xlane.xlu0 %337  ;;  %v439_v4 = vpop.permute.xlu1 %438 }
 0x3d9   :  { %1568 = vrcp.f32 %v338_v61 }
 0x3dc   :  { %v558_v6 = vpop.permute.xlu1 %557 }
 0x3e0   :  { %v676_v8 = vpop.permute.xlu1 %675 }
 0x3e2   :  { %v1567_v62 = vpop.eup %1566 }
 0x3e3   :  { %v341_v0 = vmul.f32 %v1567_v62, %v1563_v49 }
 0x3e4   :  { %v805_v9 = vpop.permute.xlu1 %804 }
 0x3e6   :  { %v1569_v63 = vpop.eup %1568 }
 0x3e7   :  { %v342_v1 = vmul.f32 %v1569_v63, %v1565_v51 }
 0x3e9   :  { %v343_v2 = vpack.c.bf16 %v342_v1, %v341_v0 }
 0x3eb   :  { %1437 = vmatmul.mubr.msk.bf16.vlgmr.msra.gmra.mxu0 %vm276_vm2, %v343_v2 }
 0x3ec   :  { %1447 = vmatpush3.bf16.msra.mxu0 %v1818_v3  ;;  %1448 = vmatprep.mubr.msk.bf16.mxu0 %vm1723_vm1, %v1722_v11 }
 0x3ed   :  { %1458 = vmatprep.subr.bf16.mxu0 %v1722_v11 }
 0x3f3   :  { %1449 = vmatmul.mubr.msk.bf16.vlgmr.msra.gmra.mxu0 %vm276_vm2, %v439_v4 }
 0x3f4   :  { %1459 = vmatpush3.bf16.msra.mxu0 %v1825_v5  ;;  %1460 = vmatprep.mubr.msk.bf16.mxu0 %vm1723_vm1, %v1722_v11 }
 0x3f5   :  { %1470 = vmatprep.subr.bf16.mxu0 %v1722_v11 }
 0x3fb   :  { %1461 = vmatmul.mubr.msk.bf16.vlgmr.msra.gmra.mxu0 %vm276_vm2, %v558_v6 }
 0x3fc   :  { %1471 = vmatpush3.bf16.msra.mxu0 %v1832_v7  ;;  %1472 = vmatprep.mubr.msk.bf16.mxu0 %vm1723_vm1, %v1722_v11 }
 0x3fd   :  { %1482 = vmatprep.subr.bf16.mxu0 %v1722_v11 }
 0x403   :  { %1473 = vmatmul.mubr.msk.bf16.vlgmr.msra.gmra.mxu0 %vm276_vm2, %v676_v8 }
 0x404   :  { %1483 = vmatpush3.bf16.msra.mxu0 %v805_v9  ;;  %1484 = vmatprep.mubr.msk.bf16.mxu0 %vm1723_vm1, %v1722_v11 }
 0x405   :  { %1494 = vmatprep.subr.bf16.mxu0 %v1722_v11 }
 0x40b   :  { %1485 = vmatmul.mubr.msk.bf16.vlgmr.msra.gmra.mxu0 %vm276_vm2, %v1785_v23 }
 0x40c   :  { %1495 = vmatpush3.bf16.msra.mxu0 %v272_v31  ;;  %1496 = vmatprep.mubr.msk.bf16.mxu0 %vm1723_vm1, %v1722_v11 }
 0x40d   :  { %1506 = vmatprep.subr.bf16.mxu0 %v1722_v11 }
 0x413   :  { %1497 = vmatmul.mubr.msk.bf16.vlgmr.msra.gmra.mxu0 %vm276_vm2, %v1561_v53 }
 0x414   :  { %1508 = vmatprep.mubr.msk.bf16.mxu0 %vm1723_vm1, %v1722_v11 }
 0x4ab   :  { %v1860_v16 = vpop.f32.mrf.mxu0 }
 0x4ad   :  { %v1438_v17 = vpop.f32.mrf.mxu0 }
 0x4af   :  { %v1862_v18 = vpop.f32.mrf.mxu0 }
 0x4b1   :  { %v1439_v20 = vpop.f32.mrf.mxu0 }
 0x4b3   :  { %v477_v22 = vpop.f32.mrf.mxu0 }
 0x4b4   :  { %v484_v24 = vsel %vm276_vm2, %v477_v22, -inf }
 0x4b5   :  { %485 = vmax.xlane.f32.xlu1 %v484_v24  ;;  %v1450_v25 = vpop.f32.mrf.mxu0 }
 0x4b7   :  { %v480_v26 = vpop.f32.mrf.mxu0 }
 0x4b8   :  { %v487_v27 = vsel %vm276_vm2, %v480_v26, -inf }
 0x4b9   :  { %488 = vmax.xlane.f32.xlu0 %v487_v27  ;;  %v1451_v28 = vpop.f32.mrf.mxu0 }
 0x4bb   :  { %v596_v29 = vpop.f32.mrf.mxu0 }
 0x4bc   :  { %v603_v30 = vsel %vm276_vm2, %v596_v29, -inf }
 0x4bd   :  { %604 = vmax.xlane.f32.xlu0 %v603_v30  ;;  %v1462_v31 = vpop.f32.mrf.mxu0 }
 0x4bf   :  { %v599_v32 = vpop.f32.mrf.mxu0 }
 0x4c0   :  { %v606_v33 = vsel %vm276_vm2, %v599_v32, -inf }
 0x4c1   :  { %607 = vmax.xlane.f32.xlu1 %v606_v33  ;;  %v1463_v34 = vpop.f32.mrf.mxu0 }
 0x4c3   :  { %v714_v35 = vpop.f32.mrf.mxu0 }
 0x4c4   :  { %v721_v36 = vsel %vm276_vm2, %v714_v35, -inf }
 0x4c5   :  { %722 = vmax.xlane.f32.xlu0 %v721_v36  ;;  %v1474_v37 = vpop.f32.mrf.mxu0 }
 0x4c7   :  { %v717_v38 = vpop.f32.mrf.mxu0 }
 0x4c8   :  { %v724_v39 = vsel %vm276_vm2, %v717_v38, -inf }
 0x4c9   :  { %725 = vmax.xlane.f32.xlu1 %v724_v39  ;;  %v1475_v40 = vpop.f32.mrf.mxu0 }
 0x4cb   :  { %v844_v41 = vpop.f32.mrf.mxu0 }
 0x4cc   :  { %v851_v42 = vsel %vm276_vm2, %v844_v41, -inf }
 0x4cd   :  { %852 = vmax.xlane.f32.xlu0 %v851_v42  ;;  %v1486_v43 = vpop.f32.mrf.mxu0 }
 0x4cf   :  { %v847_v44 = vpop.f32.mrf.mxu0 }
 0x4d0   :  { %v854_v45 = vsel %vm276_vm2, %v847_v44, -inf }
 0x4d1   :  { %855 = vmax.xlane.f32.xlu1 %v854_v45  ;;  %v1487_v46 = vpop.f32.mrf.mxu0 }
 0x53e   :  { %v486_v47 = vpop.xlane.xlu1 %485 }
 0x53f   :  { %v490_v48 = vsub.f32 %v477_v22, %v486_v47 }
 0x541   :  { %v492_v49 = vmul.f32 1.442695, %v490_v48 }
 0x542   :  { %v489_v50 = vpop.xlane.xlu0 %488 }
 0x543   :  { %1570 = vpow2.f32 %v492_v49  ;;  %v491_v51 = vsub.f32 %v480_v26, %v489_v50 }
 0x545   :  { %v494_v52 = vmul.f32 1.442695, %v491_v51 }
 0x546   :  { %v605_v53 = vpop.xlane.xlu0 %604 }
 0x547   :  { %1572 = vpow2.f32 %v494_v52  ;;  %v609_v54 = vsub.f32 %v596_v29, %v605_v53 }
 0x549   :  { %v611_v55 = vmul.f32 1.442695, %v609_v54 }
 0x54a   :  { %v608_v56 = vpop.xlane.xlu1 %607 }
 0x54b   :  { %1574 = vpow2.f32 %v611_v55  ;;  %v610_v57 = vsub.f32 %v599_v32, %v608_v56  ;;  %v1920_v56 = vpack.c.bf16 %v1858_v15, %v1781_v21 }
 0x54d   :  { %v613_v58 = vmul.f32 1.442695, %v610_v57 }
 0x54e   :  { %v723_v59 = vpop.xlane.xlu0 %722 }
 0x54f   :  { %1576 = vpow2.f32 %v613_v58  ;;  %v727_v60 = vsub.f32 %v714_v35, %v723_v59 }
 0x550   :  { %v1872_v61 = vpop.eup %1570 }
 0x551   :  { %v729_v62 = vmul.f32 1.442695, %v727_v60  ;;  %v496_v63 = vsel %vm276_vm2, %v1872_v61, 0.0 }
 0x552   :  { %v726_v0 = vpop.xlane.xlu1 %725  ;;  %497 = vadd.xlane.f32.xlu0 %v496_v63 }
 0x553   :  { %1578 = vpow2.f32 %v729_v62  ;;  %v728_v1 = vsub.f32 %v717_v38, %v726_v0 }
 0x554   :  { %v1573_v2 = vpop.eup %1572 }
 0x555   :  { %v731_v4 = vmul.f32 1.442695, %v728_v1  ;;  %v499_v6 = vsel %vm276_vm2, %v1573_v2, 0.0 }
 0x556   :  { %v853_v8 = vpop.xlane.xlu0 %852  ;;  %500 = vadd.xlane.f32.xlu1 %v499_v6 }
 0x557   :  { %1580 = vpow2.f32 %v731_v4  ;;  %v857_v9 = vsub.f32 %v844_v41, %v853_v8 }
 0x558   :  { %v1575_v12 = vpop.eup %1574 }
 0x559   :  { %v859_v14 = vmul.f32 1.442695, %v857_v9  ;;  %v615_v17 = vsel %vm276_vm2, %v1575_v12, 0.0 }
 0x55a   :  { %616 = vadd.xlane.f32.xlu0 %v615_v17  ;;  %v856_v30 = vpop.xlane.xlu1 %855 }
 0x55b   :  { %1582 = vpow2.f32 %v859_v14  ;;  %v858_v31 = vsub.f32 %v847_v44, %v856_v30  ;;  %v1951_v30 = vld [vmem:[%s2005_s3] ss:$0 sm:$0xff]  ;;  %s1728_s3 = smov [#allocation8]  }
 0x55c   :  { %v1577_v20 = vpop.eup %1576  ;;  %s1337_s13 = sshll.u32 %s1728_s3, 4  ;;  %s1338_s13 = int_to_ptr.vmem [resolvable:$true] %s1337_s13 }
 0x55d   :  { %v618_v22 = vsel %vm276_vm2, %v1577_v20, 0.0  ;;  %v861_v32 = vmul.f32 1.442695, %v858_v31  ;;  %s1686_s14 = scalar_lea.vmem %s1338_s13, 512  ;;  %p1691_p2 = scmp.lt.s32.totalorder %s1338_s13, %s1338_s13 }
 0x55e   :  { %619 = vadd.xlane.f32.xlu1 %v618_v22  ;;  %p1687_p1 = scmp.ne.s32.totalorder %s1338_s13, %s1686_s14  ;;  %p1692_p3 = scmp.lt.s32.totalorder %s1686_s14, %s1686_s14 }
 0x55f   :  { %1584 = vpow2.f32 %v861_v32 }
 0x560   :  { %v1879_v24 = vpop.eup %1578  ;;  %p1693_p4 = por %p1692_p3, %p1691_p2 }
 0x561   :  { %v733_v25 = vsel %vm276_vm2, %v1879_v24, 0.0 }
 0x562   :  { %734 = vadd.xlane.f32.xlu0 %v733_v25  ;;  %p1694_p5 = pnand %p1693_p4, %p1687_p1 }
 0x564   :  { %v1581_v26 = vpop.eup %1580 }
 0x565   :  { %v736_v27 = vsel %vm276_vm2, %v1581_v26, 0.0 }
 0x566   :  { %737 = vadd.xlane.f32.xlu1 %v736_v27 }
 0x568   :  { %v1884_v28 = vpop.eup %1582 }
 0x569   :  { %v863_v29 = vsel %vm276_vm2, %v1884_v28, 0.0 }
 0x56a   :  { %864 = vadd.xlane.f32.xlu0 %v863_v29 }
 0x56c   :  { %v1585_v33 = vpop.eup %1584 }
 0x56d   :  { %v866_v34 = vsel %vm276_vm2, %v1585_v33, 0.0 }
 0x577   :  { %626 = vrot.lane.b32.xlu1 %v1776_v19, %s1719_s5 }
 0x580   :  { %508 = vrot.lane.b32.xlu0 %v1776_v19, %s1725_s2 }
 0x584   :  { %963 = vrot.lane.b32.xlu0 %v1818_v3, %s1724_s0 }
 0x588   :  { %1086 = vrot.lane.b32.xlu0 %v1825_v5, %s1724_s0 }
 0x58c   :  { %1208 = vrot.lane.b32.xlu0 %v1832_v7, %s1724_s0 }
 0x59b   :  { %867 = vadd.xlane.f32.xlu1 %v866_v34 }
 0x5ac   :  { %744 = vrot.lane.b32.xlu1 %v1776_v19, %s1727_s10 }
 0x5b0   :  { %960 = vrot.lane.b32.xlu1 %v1785_v23, %s1724_s0 }
 0x5b4   :  { %1083 = vrot.lane.b32.xlu1 %v1785_v23, %s1725_s2 }
 0x5b8   :  { %1205 = vrot.lane.b32.xlu1 %v1785_v23, %s1726_s9 }
 0x5db   :  { %v498_v5 = vpop.xlane.xlu0 %497 }
 0x5df   :  { %v501_v3 = vpop.xlane.xlu1 %500 }
 0x5e0   :  { %1586 = vrcp.f32 %v501_v3 }
 0x5e1   :  { %1588 = vrcp.f32 %v498_v5 }
 0x5e3   :  { %v617_v35 = vpop.xlane.xlu0 %616 }
 0x5e7   :  { %v620_v7 = vpop.xlane.xlu1 %619 }
 0x5e8   :  { %1590 = vrcp.f32 %v620_v7 }
 0x5e9   :  { %1592 = vrcp.f32 %v617_v35 }
 0x5eb   :  { %v735_v36 = vpop.xlane.xlu0 %734 }
 0x5ed   :  { %v1587_v37 = vpop.eup %1586 }
 0x5ee   :  { %v1589_v38 = vpop.eup %1588  ;;  %v505_v40 = vmul.f32 %v1587_v37, %v1573_v2  ;;  %v1940_v2 = vpop.f32.mrf.mxu0 }
 0x5ef   :  { %v738_v39 = vpop.xlane.xlu1 %737  ;;  %v504_v42 = vmul.f32 %v1589_v38, %v1872_v61 }
 0x5f0   :  { %1594 = vrcp.f32 %v738_v39  ;;  %v1498_v4 = vpop.f32.mrf.mxu0 }
 0x5f1   :  { %v506_v23 = vpack.c.bf16 %v505_v40, %v504_v42  ;;  %1596 = vrcp.f32 %v735_v36 }
 0x5f2   :  { %v1942_v6 = vpop.f32.mrf.mxu0 }
 0x5f3   :  { %v865_v19 = vpop.xlane.xlu0 %864  ;;  %v627_v44 = vpop.permute.xlu1 %626 }
 0x5f4   :  { %1598 = vrcp.f32 %v865_v19  ;;  %v1499_v8 = vpop.f32.mrf.mxu0 }
 0x5f5   :  { %v1591_v43 = vpop.eup %1590 }
 0x5f6   :  { %v1593_v45 = vpop.eup %1592  ;;  %v624_v46 = vmul.f32 %v1591_v43, %v1577_v20 }
 0x5f7   :  { %v509_v41 = vpop.permute.xlu0 %508  ;;  %v623_v47 = vmul.f32 %v1593_v45, %v1575_v12 }
 0x5f8   :  { %1453 = vmatpush3.bf16.msra.mxu1 %v509_v41 }
 0x5f9   :  { %1464 = vmatprep.subr.bf16.mxu1 %v1722_v11  ;;  %v625_v48 = vpack.c.bf16 %v624_v46, %v623_v47 }
 0x5fb   :  { %1455 = vmatmul.mubr.msk.bf16.vlgmr.msra.gmra.mxu1 %vm276_vm2, %v506_v23  ;;  %v964_v62 = vpop.permute.xlu0 %963 }
 0x5fc   :  { %1465 = vmatpush3.bf16.msra.mxu1 %v627_v44  ;;  %1466 = vmatprep.mubr.msk.bf16.mxu1 %vm1723_vm1, %v1722_v11 }
 0x5fd   :  { %1476 = vmatprep.subr.bf16.mxu1 %v1722_v11  ;;  %v1595_v49 = vpop.eup %1594 }
 0x5fe   :  { %v1597_v51 = vpop.eup %1596  ;;  %v742_v52 = vmul.f32 %v1595_v49, %v1581_v26  ;;  %v431_v26 = vadd.f32 %v1854_v10, %v1860_v16 }
 0x5ff   :  { %v741_v54 = vmul.f32 %v1597_v51, %v1879_v24  ;;  %v1087_v15 = vpop.permute.xlu0 %1086 }
 0x601   :  { %v743_v55 = vpack.c.bf16 %v742_v52, %v741_v54  ;;  %v1599_v57 = vpop.eup %1598 }
 0x602   :  { %v871_v59 = vmul.f32 %v1599_v57, %v1884_v28  ;;  %v434_v28 = vadd.f32 %v1856_v13, %v1862_v18 }
 0x603   :  { %1467 = vmatmul.mubr.msk.bf16.vlgmr.msra.gmra.mxu1 %vm276_vm2, %v625_v48  ;;  %v1209_v0 = vpop.permute.xlu0 %1208 }
 0x604   :  { %1478 = vmatprep.mubr.msk.bf16.mxu1 %vm1723_vm1, %v1722_v11 }
 0x624   :  { %v868_v50 = vpop.xlane.xlu1 %867 }
 0x625   :  { %1600 = vrcp.f32 %v868_v50 }
 0x628   :  { %v745_v53 = vpop.permute.xlu1 %744 }
 0x629   :  { %1477 = vmatpush3.bf16.msra.mxu1 %v745_v53 }
 0x62a   :  { %1488 = vmatprep.subr.bf16.mxu1 %v1722_v11 }
 0x62c   :  { %1479 = vmatmul.mubr.msk.bf16.vlgmr.msra.gmra.mxu1 %vm276_vm2, %v743_v55  ;;  %v961_v21 = vpop.permute.xlu1 %960 }
 0x62d   :  { %1489 = vmatpush3.bf16.msra.mxu1 %v1920_v56  ;;  %1490 = vmatprep.mubr.msk.bf16.mxu1 %vm1723_vm1, %v1722_v11 }
 0x62e   :  { %1500 = vmatprep.subr.bf16.mxu1 %v1722_v11 }
 0x630   :  { %v1084_v63 = vpop.permute.xlu1 %1083 }
 0x632   :  { %v1601_v58 = vpop.eup %1600 }
 0x633   :  { %v872_v60 = vmul.f32 %v1601_v58, %v1585_v33 }
 0x634   :  { %v1206_v1 = vpop.permute.xlu1 %1205 }
 0x635   :  { %v873_v61 = vpack.c.bf16 %v872_v60, %v871_v59 }
 0x637   :  { %1491 = vmatmul.mubr.msk.bf16.vlgmr.msra.gmra.mxu1 %vm276_vm2, %v873_v61 }
 0x638   :  { %1501 = vmatpush3.bf16.msra.mxu1 %v964_v62  ;;  %1502 = vmatprep.mubr.msk.bf16.mxu1 %vm1723_vm1, %v1722_v11 }
 0x639   :  { %1512 = vmatprep.subr.bf16.mxu1 %v1722_v11 }
 0x63f   :  { %1503 = vmatmul.mubr.msk.bf16.vlgmr.msra.gmra.mxu1 %vm276_vm2, %v961_v21 }
 0x640   :  { %1513 = vmatpush3.bf16.msra.mxu1 %v1087_v15  ;;  %1514 = vmatprep.mubr.msk.bf16.mxu1 %vm1723_vm1, %v1722_v11 }
 0x641   :  { %1524 = vmatprep.subr.bf16.mxu1 %v1722_v11 }
 0x647   :  { %1515 = vmatmul.mubr.msk.bf16.vlgmr.msra.gmra.mxu1 %vm276_vm2, %v1084_v63 }
 0x648   :  { %1525 = vmatpush3.bf16.msra.mxu1 %v1209_v0  ;;  %1526 = vmatprep.mubr.msk.bf16.mxu1 %vm1723_vm1, %v1722_v11 }
 0x64f   :  { %1527 = vmatmul.mubr.msk.bf16.vlgmr.msra.gmra.mxu1 %vm276_vm2, %v1206_v1 }
 0x6bb   :  { %v548_v9 = vpop.f32.mrf.mxu1 }
 0x6bc   :  { %v555_v27 = vadd.f32 %v548_v9, %v431_v26 }
 0x6bd   :  { %v1456_v12 = vpop.f32.mrf.mxu1 }
 0x6bf   :  { %v551_v14 = vpop.f32.mrf.mxu1 }
 0x6c0   :  { %v556_v32 = vadd.f32 %v551_v14, %v434_v28 }
 0x6c1   :  { %v1457_v17 = vpop.f32.mrf.mxu1 }
 0x6c3   :  { %v666_v20 = vpop.f32.mrf.mxu1 }
 0x6c4   :  { %v673_v29 = vadd.f32 %v666_v20, %v555_v27 }
 0x6c5   :  { %v1468_v22 = vpop.f32.mrf.mxu1 }
 0x6c7   :  { %v669_v24 = vpop.f32.mrf.mxu1 }
 0x6c8   :  { %v674_v3 = vadd.f32 %v669_v24, %v556_v32 }
 0x6c9   :  { %v1469_v25 = vpop.f32.mrf.mxu1 }
 0x6ec   :  { %v784_v31 = vpop.f32.mrf.mxu1 }
 0x6ed   :  { %v791_v33 = vadd.f32 %v784_v31, %v673_v29 }
 0x6ee   :  { %v1480_v34 = vpop.f32.mrf.mxu1 }
 0x6ef   :  { %v799_v5 = vadd.f32 %v1951_v30, %v791_v33 }
 0x6f0   :  { %v787_v7 = vpop.f32.mrf.mxu1 }
 0x6f1   :  { %801 = vst.msk [vmem:[#allocation8] sm:$0xff] %vm106_vm0, %v799_v5  ;;  %v792_v10 = vadd.f32 %v787_v7, %v674_v3 }
 0x6f2   :  { %v1481_v16 = vpop.f32.mrf.mxu1 }
 0x6f3   :  { %v800_v13 = vadd.f32 %v1951_v30, %v792_v10 }
 0x6f5   :  { %802 = vst.msk [vmem:[#allocation8 + $0x8] sm:$0xff] %vm106_vm0, %v800_v13 }
 0x6f7   :  { %v1957_v18 = vpop.f32.mrf.mxu1 }
 0x6f9   :  { %v1492_v35 = vpop.f32.mrf.mxu1 }
 0x6fb   :  { %v1959_v36 = vpop.f32.mrf.mxu1 }
 0x6fd   :  { %v1493_v37 = vpop.f32.mrf.mxu1 }
 0x6ff   :  { %v1003_v19 = vpop.f32.mrf.mxu1 }
 0x700   :  { %v1010_v38 = vsel %vm276_vm2, %v1003_v19, -inf }
 0x701   :  { %1011 = vmax.xlane.f32.xlu0 %v1010_v38  ;;  %v1504_v39 = vpop.f32.mrf.mxu1 }
 0x703   :  { %v1006_v40 = vpop.f32.mrf.mxu1 }
 0x704   :  { %v1013_v41 = vsel %vm276_vm2, %v1006_v40, -inf }
 0x705   :  { %1014 = vmax.xlane.f32.xlu1 %v1013_v41  ;;  %v1505_v42 = vpop.f32.mrf.mxu1 }
 0x707   :  { %v1126_v23 = vpop.f32.mrf.mxu1 }
 0x708   :  { %v1133_v43 = vsel %vm276_vm2, %v1126_v23, -inf }
 0x709   :  { %1134 = vmax.xlane.f32.xlu0 %v1133_v43  ;;  %v1516_v44 = vpop.f32.mrf.mxu1 }
 0x70b   :  { %v1129_v45 = vpop.f32.mrf.mxu1 }
 0x70c   :  { %v1136_v46 = vsel %vm276_vm2, %v1129_v45, -inf }
 0x70d   :  { %1137 = vmax.xlane.f32.xlu0 %v1136_v46  ;;  %v1517_v47 = vpop.f32.mrf.mxu1 }
 0x70f   :  { %v1248_v48 = vpop.f32.mrf.mxu1 }
 0x710   :  { %v1255_v49 = vsel %vm276_vm2, %v1248_v48, -inf }
 0x711   :  { %1256 = vmax.xlane.f32.xlu1 %v1255_v49  ;;  %v1528_v50 = vpop.f32.mrf.mxu1 }
 0x713   :  { %v1251_v51 = vpop.f32.mrf.mxu1 }
 0x714   :  { %v1258_v52 = vsel %vm276_vm2, %v1251_v51, -inf }
 0x715   :  { %1259 = vmax.xlane.f32.xlu0 %v1258_v52  ;;  %v1529_v53 = vpop.f32.mrf.mxu1 }
 0x722   :  { %1034 = vrot.lane.b32.xlu1 %v1920_v56, %s1725_s2 }
 0x78a   :  { %v1012_v54 = vpop.xlane.xlu0 %1011 }
 0x78b   :  { %v1016_v55 = vsub.f32 %v1003_v19, %v1012_v54 }
 0x78d   :  { %v1018_v57 = vmul.f32 1.442695, %v1016_v55 }
 0x78e   :  { %v1015_v58 = vpop.xlane.xlu1 %1014 }
 0x78f   :  { %1602 = vpow2.f32 %v1018_v57  ;;  %v1017_v59 = vsub.f32 %v1006_v40, %v1015_v58  ;;  %v953_v57 = vadd.f32 %v1940_v2, %v1957_v18 }
 0x791   :  { %v1020_v60 = vmul.f32 1.442695, %v1017_v59 }
 0x792   :  { %v1135_v61 = vpop.xlane.xlu0 %1134 }
 0x793   :  { %1604 = vpow2.f32 %v1020_v60  ;;  %v1139_v62 = vsub.f32 %v1126_v23, %v1135_v61 }
 0x795   :  { %v1141_v21 = vmul.f32 1.442695, %v1139_v62 }
 0x796   :  { %v1138_v15 = vpop.xlane.xlu0 %1137 }
 0x797   :  { %1606 = vpow2.f32 %v1141_v21  ;;  %v1140_v63 = vsub.f32 %v1129_v45, %v1138_v15 }
 0x799   :  { %v1143_v0 = vmul.f32 1.442695, %v1140_v63 }
 0x79a   :  { %v1257_v1 = vpop.xlane.xlu1 %1256 }
 0x79b   :  { %1608 = vpow2.f32 %v1143_v0  ;;  %v1261_v4 = vsub.f32 %v1248_v48, %v1257_v1 }
 0x79c   :  { %v1603_v8 = vpop.eup %1602 }
 0x79d   :  { %v1263_v9 = vmul.f32 1.442695, %v1261_v4  ;;  %v1022_v12 = vsel %vm276_vm2, %v1603_v8, 0.0 }
 0x79e   :  { %1023 = vadd.xlane.f32.xlu1 %v1022_v12  ;;  %v1035_v14 = vpop.permute.xlu1 %1034  ;;  %v1260_v17 = vpop.xlane.xlu0 %1259 }
 0x79f   :  { %1610 = vpow2.f32 %v1263_v9  ;;  %v1262_v20 = vsub.f32 %v1251_v51, %v1260_v17  ;;  %1507 = vmatpush3.bf16.msra.mxu0 %v1035_v14 }
 0x7a0   :  { %v1605_v22 = vpop.eup %1604  ;;  %1518 = vmatprep.subr.bf16.mxu0 %v1722_v11 }
 0x7a1   :  { %v1265_v24 = vmul.f32 1.442695, %v1262_v20  ;;  %v1025_v25 = vsel %vm276_vm2, %v1605_v22, 0.0 }
 0x7a2   :  { %1026 = vadd.xlane.f32.xlu0 %v1025_v25 }
 0x7a3   :  { %1612 = vpow2.f32 %v1265_v24 }
 0x7a4   :  { %v1607_v26 = vpop.eup %1606 }
 0x7a5   :  { %v1145_v27 = vsel %vm276_vm2, %v1607_v26, 0.0 }
 0x7a6   :  { %1146 = vadd.xlane.f32.xlu1 %v1145_v27 }
 0x7a8   :  { %v1609_v28 = vpop.eup %1608 }
 0x7a9   :  { %v1148_v29 = vsel %vm276_vm2, %v1609_v28, 0.0 }
 0x7aa   :  { %1149 = vadd.xlane.f32.xlu0 %v1148_v29 }
 0x7ac   :  { %v1611_v31 = vpop.eup %1610 }
 0x7ad   :  { %v1267_v32 = vsel %vm276_vm2, %v1611_v31, 0.0 }
 0x7ae   :  { %1268 = vadd.xlane.f32.xlu1 %v1267_v32 }
 0x7b0   :  { %v1613_v33 = vpop.eup %1612 }
 0x7b1   :  { %v1270_v34 = vsel %vm276_vm2, %v1613_v33, 0.0 }
 0x7b2   :  { %1271 = vadd.xlane.f32.xlu0 %v1270_v34 }
 0x7bf   :  { %1278 = vrot.lane.b32.xlu1 %v1920_v56, %s1727_s10 }
 0x7c8   :  { %1156 = vrot.lane.b32.xlu0 %v1920_v56, %s1719_s5 }
 0x827   :  { %v1024_v3 = vpop.xlane.xlu1 %1023 }
 0x828   :  { %1614 = vrcp.f32 %v1024_v3 }
 0x82b   :  { %v1027_v5 = vpop.xlane.xlu0 %1026 }
 0x82c   :  { %1616 = vrcp.f32 %v1027_v5 }
 0x82f   :  { %v1147_v7 = vpop.xlane.xlu1 %1146 }
 0x830   :  { %1618 = vrcp.f32 %v1147_v7 }
 0x833   :  { %v1150_v10 = vpop.xlane.xlu0 %1149 }
 0x834   :  { %1620 = vrcp.f32 %v1150_v10 }
 0x835   :  { %v1615_v16 = vpop.eup %1614 }
 0x836   :  { %v1030_v37 = vmul.f32 %v1615_v16, %v1603_v8 }
 0x837   :  { %v1269_v13 = vpop.xlane.xlu1 %1268 }
 0x838   :  { %1622 = vrcp.f32 %v1269_v13 }
 0x839   :  { %v1617_v35 = vpop.eup %1616 }
 0x83a   :  { %v1031_v19 = vmul.f32 %v1617_v35, %v1605_v22 }
 0x83b   :  { %v1272_v38 = vpop.xlane.xlu0 %1271  ;;  %v1279_v44 = vpop.permute.xlu1 %1278 }
 0x83c   :  { %1624 = vrcp.f32 %v1272_v38  ;;  %v1032_v39 = vpack.c.bf16 %v1031_v19, %v1030_v37 }
 0x83d   :  { %v1619_v56 = vpop.eup %1618 }
 0x83e   :  { %1509 = vmatmul.mubr.msk.bf16.vlgmr.msra.gmra.mxu0 %vm276_vm2, %v1032_v39  ;;  %v1153_v42 = vmul.f32 %v1619_v56, %v1607_v26 }
 0x83f   :  { %v1157_v40 = vpop.permute.xlu0 %1156  ;;  %1520 = vmatprep.mubr.msk.bf16.mxu0 %vm1723_vm1, %v1722_v11 }
 0x840   :  { %1519 = vmatpush3.bf16.msra.mxu0 %v1157_v40 }
 0x841   :  { %v1621_v41 = vpop.eup %1620  ;;  %1530 = vmatprep.subr.bf16.mxu0 %v1722_v11 }
 0x842   :  { %v1154_v23 = vmul.f32 %v1621_v41, %v1609_v28 }
 0x844   :  { %v1155_v43 = vpack.c.bf16 %v1154_v23, %v1153_v42 }
 0x845   :  { %v1623_v45 = vpop.eup %1622 }
 0x846   :  { %1521 = vmatmul.mubr.msk.bf16.vlgmr.msra.gmra.mxu0 %vm276_vm2, %v1155_v43  ;;  %v1275_v47 = vmul.f32 %v1623_v45, %v1611_v31 }
 0x847   :  { %1531 = vmatpush3.bf16.msra.mxu0 %v1279_v44  ;;  %1532 = vmatprep.mubr.msk.bf16.mxu0 %vm1723_vm1, %v1722_v11  ;;  %v956_v11 = vadd.f32 %v1942_v6, %v1959_v36 }
 0x849   :  { %v1625_v46 = vpop.eup %1624 }
 0x84a   :  { %v1276_v48 = vmul.f32 %v1625_v46, %v1613_v33 }
 0x84c   :  { %v1277_v49 = vpack.c.bf16 %v1276_v48, %v1275_v47 }
 0x84e   :  { %1533 = vmatmul.mubr.msk.bf16.vlgmr.msra.gmra.mxu0 %vm276_vm2, %v1277_v49 }
 0x8fe   :  { %v1074_v50 = vpop.f32.mrf.mxu0 }
 0x8ff   :  { %v1081_v59 = vadd.f32 %v1074_v50, %v953_v57 }
 0x900   :  { %v1510_v51 = vpop.f32.mrf.mxu0 }
 0x902   :  { %v1077_v52 = vpop.f32.mrf.mxu0 }
 0x903   :  { %v1082_v21 = vadd.f32 %v1077_v52, %v956_v11 }
 0x904   :  { %v1511_v53 = vpop.f32.mrf.mxu0 }
 0x906   :  { %v1196_v54 = vpop.f32.mrf.mxu0 }
 0x907   :  { %v1203_v61 = vadd.f32 %v1196_v54, %v1081_v59 }
 0x908   :  { %v1522_v55 = vpop.f32.mrf.mxu0 }
 0x90a   :  { %v1199_v58 = vpop.f32.mrf.mxu0 }
 0x90b   :  { %v1204_v0 = vadd.f32 %v1199_v58, %v1082_v21 }
 0x90c   :  { %v1523_v60 = vpop.f32.mrf.mxu0 }
 0x90e   :  { %v1318_v62 = vpop.f32.mrf.mxu0 }
 0x90f   :  { %v1325_v15 = vadd.f32 %v1318_v62, %v1203_v61 }
 0x910   :  { %v1534_v63 = vpop.f32.mrf.mxu0 }
 0x911   :  { %v1327_v1 = vadd.f32 %v1951_v30, %v1325_v15 }
 0x912   :  { %v1321_v4 = vpop.f32.mrf.mxu0 }
 0x913   :  { %1330 = vst.msk [vmem:[#allocation8 + $0x10] sm:$0xff] %vm106_vm0, %v1327_v1  ;;  %v1326_v2 = vadd.f32 %v1321_v4, %v1204_v0 }
 0x914   :  { %v1535_v18 = vpop.f32.mrf.mxu0 }
 0x915   :  { %v1328_v8 = vadd.f32 %v1951_v30, %v1326_v2 }
 0x917   :  { %1331 = vst.msk [vmem:[#allocation8 + $0x18] sm:$0xff] %vm106_vm0, %v1328_v8 }
 0x918   :  { %1697 = shalt.err (!%p1694_p5)
}
 0x919   :  { %1343 = dma.vmem_to_hbm [thread:$0]  %s1338_s13, 512, %s2006_s4, [#allocation4], %s1716_s25, %s1716_s25, %s1717_s26  }
 0x91a   :  { %1710 = dma.done.wait [#allocation4], 512  }
 0x91b   :  { %1711 = vsyncadd [#allocation4], 4294966784 }
 0x91c   :  { %1347 = vsyncpa [#allocation3], 1 }
 0x91d   :  { %1348 = vsyncpa [#allocation6], 1 }
 0x91e   :  { %1349 = vsyncpa [#allocation4], 1 }

</bundles_post_ra>
